<compile_context>
chip_gen: v6e
topology: v6e:2x2x1
jax: 0.10.0
libtpu: 0.0.40
codegen_flags: <defaults>
</compile_context>

<pallas_src>
import jax
import jax.numpy as jnp
from jax.experimental import pallas as pl
from jax.experimental.pallas import tpu as pltpu

EPS = 1e-5


def _round_up(n, m):
    return ((n + m - 1) // m) * m


def _make_prenorm_kernel(d_orig, d_pad, compute_dtype):
    """Fused LayerNorm (affine folded into W/b) + Linear kernel.

    d_orig : real LayerNorm dim (stats computed over this many lanes)
    d_pad  : lane-padded dim (multiple of 128) seen by the kernel
    compute_dtype : dtype of the MXU operands
    """
    inv_d = 1.0 / float(d_orig)
    needs_mask = d_pad != d_orig

    def kernel(x_ref, w_ref, bias_ref, o_ref):
        # x_ref:    (tm, d_pad)       token tile (padded lanes are zero)
        # w_ref:    (d_pad, d_pad)    gamma-folded weight, compute_dtype,
        #                             zero-padded rows/cols
        # bias_ref: (1, d_pad) f32    beta-folded bias (padded lanes zero)
        x = x_ref[...].astype(jnp.float32)

        # --- LayerNorm over the *real* last dim (biased var, like nn.LayerNorm)
        mean = jnp.sum(x, axis=-1, keepdims=True) * inv_d  # padded lanes are 0
        centered = x - mean
        if needs_mask:
            lane = jax.lax.broadcasted_iota(jnp.int32, x.shape, 1)
            centered = jnp.where(lane < d_orig, centered, 0.0)
        var = jnp.sum(centered * centered, axis=-1, keepdims=True) * inv_d
        xn = centered * jax.lax.rsqrt(var + EPS)   # padded lanes stay 0

        # --- fn(x): Linear on the MXU (gamma/beta folded into W/b), f32 acc.
        out = jnp.dot(xn.astype(compute_dtype), w_ref[...],
                      preferred_element_type=jnp.float32)
        out = out + bias_ref[...]

        o_ref[...] = out.astype(o_ref.dtype)

    return kernel


def prenorm_linear(x, gamma, beta, w, bias, *,
                   tm=256, compute_dtype=jnp.bfloat16):
    """x: [B, S, D] -> fn(LayerNorm(x)) : [B, S, D]  (fn = Linear(D, D))."""
    B, S, D = x.shape
    N = B * S

    # Lane-dense channel dim (>=128, multiple of 128).
    D_pad = _round_up(max(D, 128), 128)

    # Row tile: multiple of 8, capped at the (rounded-up) token count; rows are
    # padded to a multiple of tm instead of asserting divisibility.
    tm = max(8, min(_round_up(tm, 8), _round_up(N, 8)))
    N_pad = _round_up(N, tm)
    grid = N_pad // tm

    x2 = x.reshape(N, D)
    if N_pad != N or D_pad != D:
        x2 = jnp.pad(x2, ((0, N_pad - N), (0, D_pad - D)))

    # Fold LN affine into the Linear (once, in f32, outside the kernel):
    #   LN(x) @ W + b = ((x-mean)*inv_std) @ (gamma[:,None]*W) + (beta@W + b)
    gamma32 = gamma.astype(jnp.float32)
    beta32 = beta.astype(jnp.float32)
    w32 = w.astype(jnp.float32)
    w_fold = gamma32[:, None] * w32
    bias_fold = beta32 @ w32 + bias.astype(jnp.float32)

    w_p = w_fold.astype(compute_dtype)
    bias_p = bias_fold
    if D_pad != D:
        w_p = jnp.pad(w_p, ((0, D_pad - D), (0, D_pad - D)))
        bias_p = jnp.pad(bias_p, (0, D_pad - D))
    bias_p = bias_p.reshape(1, D_pad)

    # VMEM budget: double-buffered in/out tiles + weight/bias (+ headroom),
    # clamped to [16 MiB, 64 MiB] so it also fits v7x's smaller VMEM.
    itemsize_x = jnp.dtype(x.dtype).itemsize
    itemsize_w = jnp.dtype(compute_dtype).itemsize
    tile_bytes = tm * D_pad * itemsize_x
    w_bytes = D_pad * D_pad * itemsize_w
    param_bytes = D_pad * 4
    vmem_limit = 2 * (2 * tile_bytes) + 2 * (w_bytes + param_bytes) + (4 << 20)
    vmem_limit = int(min(max(vmem_limit, 16 << 20), 64 << 20))

    out = pl.pallas_call(
        _make_prenorm_kernel(D, D_pad, compute_dtype),
        out_shape=jax.ShapeDtypeStruct((N_pad, D_pad), x.dtype),
        grid_spec=pltpu.PrefetchScalarGridSpec(
            num_scalar_prefetch=0,
            grid=(grid,),
            in_specs=[
                pl.BlockSpec((tm, D_pad), lambda i: (i, 0)),      # x tile
                pl.BlockSpec((D_pad, D_pad), lambda i: (0, 0)),   # folded W
                pl.BlockSpec((1, D_pad), lambda i: (0, 0)),       # folded bias
            ],
            out_specs=pl.BlockSpec((tm, D_pad), lambda i: (i, 0)),
        ),
        compiler_params=pltpu.CompilerParams(
            dimension_semantics=("parallel",),
            vmem_limit_bytes=vmem_limit,
        ),
    )(x2, w_p, bias_p)

    return out[:N, :D].reshape(B, S, D)


def prenorm_reference(x, gamma, beta, w, bias):
    x32 = x.astype(jnp.float32)
    mean = jnp.mean(x32, axis=-1, keepdims=True)
    var = jnp.mean((x32 - mean) ** 2, axis=-1, keepdims=True)
    xn = (x32 - mean) / jnp.sqrt(var + EPS)
    y = xn * gamma + beta
    return (y @ w + bias).astype(x.dtype)


if __name__ == "__main__":
    key = jax.random.PRNGKey(0)
    B, S, D = 2, 8, 32

    k_x, k_g, k_b, k_w, k_c = jax.random.split(key, 5)
    x = jax.random.normal(k_x, (B, S, D), dtype=jnp.float32)
    gamma = 1.0 + 0.1 * jax.random.normal(k_g, (D,), dtype=jnp.float32)
    beta = 0.1 * jax.random.normal(k_b, (D,), dtype=jnp.float32)
    w = jax.random.normal(k_w, (D, D), dtype=jnp.float32) / jnp.sqrt(D)
    bias = 0.1 * jax.random.normal(k_c, (D,), dtype=jnp.float32)

    ref = prenorm_reference(x, gamma, beta, w, bias)

    # Exact-dtype path (f32 MXU operands) -> tight tolerance.
    out_f32 = jax.block_until_ready(
        prenorm_linear(x, gamma, beta, w, bias, compute_dtype=jnp.float32))
    assert out_f32.shape == (B, S, D)
    assert jnp.allclose(out_f32, ref, atol=1e-4, rtol=1e-4), "f32 path mismatch"

    # Default fast path (bf16 MXU operands, f32 accumulation) -> bf16 tolerance.
    out_bf16 = jax.block_until_ready(prenorm_linear(x, gamma, beta, w, bias))
    assert out_bf16.shape == (B, S, D)
    assert jnp.allclose(out_bf16, ref, atol=5e-2, rtol=5e-2), "bf16 path mismatch"

    print("KERNEL_OK")
</pallas_src>

<mosaic_0001>
module attributes {stable_mosaic.version = 11 : i64} {
  func.func @kernel(%arg0: i32, %arg1: memref<16x128xf32, #tpu.memory_space<vmem>>, %arg2: memref<128x128xf32, #tpu.memory_space<vmem>>, %arg3: memref<1x128xf32, #tpu.memory_space<vmem>>, %arg4: memref<16x128xf32, #tpu.memory_space<vmem>>) attributes {dimension_semantics = [#tpu.dimension_semantics<parallel>], iteration_bounds = array<i64: 1>, scalar_prefetch = 0 : i64, scratch_operands = 0 : i64, tpu.core_type = #tpu.core_type<tc>, window_params = [{transform_indices = @transform_0, window_bounds = array<i64: 16, 128>}, {pipeline_mode = #tpu.pipeline_mode<synchronous>, transform_indices = @transform_1, window_bounds = array<i64: 128, 128>}, {pipeline_mode = #tpu.pipeline_mode<synchronous>, transform_indices = @transform_2, window_bounds = array<i64: 1, 128>}, {transform_indices = @transform_3, window_bounds = array<i64: 16, 128>}]} {
    %c0 = arith.constant 0 : index
    %c0_0 = arith.constant 0 : index
    %0 = vector.load %arg1[%c0, %c0_0] : memref<16x128xf32, #tpu.memory_space<vmem>>, vector<16x128xf32>
    %cst = arith.constant dense<0.000000e+00> : vector<16xf32>
    %1 = vector.multi_reduction <add>, %0, %cst [1] : vector<16x128xf32> to vector<16xf32>
    %2 = vector.shape_cast %1 : vector<16xf32> to vector<16x1xf32>
    %cst_1 = arith.constant 3.125000e-02 : f32
    %3 = vector.broadcast %cst_1 : f32 to vector<16x1xf32>
    %4 = arith.mulf %2, %3 : vector<16x1xf32>
    %5 = vector.broadcast %4 : vector<16x1xf32> to vector<16x128xf32>
    %6 = arith.subf %0, %5 : vector<16x128xf32>
    %7 = tpu.iota {dimensions = array<i32: 1>} : vector<16x128xi32>
    %c32_i32 = arith.constant 32 : i32
    %8 = vector.broadcast %c32_i32 : i32 to vector<16x128xi32>
    %9 = arith.cmpi slt, %7, %8 : vector<16x128xi32>
    %cst_2 = arith.constant 0.000000e+00 : f32
    %10 = vector.broadcast %cst_2 : f32 to vector<16x128xf32>
    %11 = arith.select %9, %6, %10 : vector<16x128xi1>, vector<16x128xf32>
    %12 = arith.mulf %11, %11 : vector<16x128xf32>
    %cst_3 = arith.constant dense<0.000000e+00> : vector<16xf32>
    %13 = vector.multi_reduction <add>, %12, %cst_3 [1] : vector<16x128xf32> to vector<16xf32>
    %14 = vector.shape_cast %13 : vector<16xf32> to vector<16x1xf32>
    %cst_4 = arith.constant 3.125000e-02 : f32
    %15 = vector.broadcast %cst_4 : f32 to vector<16x1xf32>
    %16 = arith.mulf %14, %15 : vector<16x1xf32>
    %cst_5 = arith.constant 9.99999974E-6 : f32
    %17 = vector.broadcast %cst_5 : f32 to vector<16x1xf32>
    %18 = arith.addf %16, %17 : vector<16x1xf32>
    %19 = math.rsqrt %18 : vector<16x1xf32>
    %20 = vector.broadcast %19 : vector<16x1xf32> to vector<16x128xf32>
    %21 = arith.mulf %11, %20 : vector<16x128xf32>
    %c0_6 = arith.constant 0 : index
    %c0_7 = arith.constant 0 : index
    %22 = vector.load %arg2[%c0_6, %c0_7] : memref<128x128xf32, #tpu.memory_space<vmem>>, vector<128x128xf32>
    %cst_8 = arith.constant dense<0.000000e+00> : vector<16x128xf32>
    %23 = tpu.matmul %21, %22, %cst_8 {dimension_numbers = #tpu.dot_dimension_numbers<[1], [0], [0], [1], [0, 0, 1, 1], [], []>} : vector<16x128xf32>, vector<128x128xf32>, vector<16x128xf32> -> vector<16x128xf32>
    %c0_9 = arith.constant 0 : index
    %c0_10 = arith.constant 0 : index
    %24 = vector.load %arg3[%c0_9, %c0_10] : memref<1x128xf32, #tpu.memory_space<vmem>>, vector<1x128xf32>
    %25 = vector.broadcast %24 : vector<1x128xf32> to vector<16x128xf32>
    %26 = arith.addf %23, %25 : vector<16x128xf32>
    %c0_11 = arith.constant 0 : index
    %c0_12 = arith.constant 0 : index
    %27 = vector.load %arg4[%c0_11, %c0_12] : memref<16x128xf32, #tpu.memory_space<vmem>>, vector<16x128xf32>
    tpu.vector_store %arg4[%c0_11, %c0_12], %26 {strides = array<i32>} : memref<16x128xf32, #tpu.memory_space<vmem>>, vector<16x128xf32>,
    return
  }
  func.func @transform_0(%arg0: i32) -> (i32, i32) {
    %c0_i32 = arith.constant 0 : i32
    %c0_i32_0 = arith.constant 0 : i32
    return %arg0, %c0_i32 : i32, i32
  }
  func.func @transform_1(%arg0: i32) -> (i32, i32) {
    %c0_i32 = arith.constant 0 : i32
    %c0_i32_0 = arith.constant 0 : i32
    %c0_i32_1 = arith.constant 0 : i32
    return %c0_i32, %c0_i32_0 : i32, i32
  }
  func.func @transform_2(%arg0: i32) -> (i32, i32) {
    %c0_i32 = arith.constant 0 : i32
    %c0_i32_0 = arith.constant 0 : i32
    %c0_i32_1 = arith.constant 0 : i32
    return %c0_i32, %c0_i32_0 : i32, i32
  }
  func.func @transform_3(%arg0: i32) -> (i32, i32) {
    %c0_i32 = arith.constant 0 : i32
    %c0_i32_0 = arith.constant 0 : i32
    return %arg0, %c0_i32 : i32, i32
  }
}

</mosaic_0001>

<bundles_post_ra>
// kernel: tpu_custom_call.1
= control target key start
LH: loop header
LB: loop body
LE: loop exit
PB: predicated region body
PF: predicated region fallthrough
CT: control target
= control target key end

     0   :  { %8 = vsyncpa [#allocation3], 0  ;;  %s365_s0 = inlined_call_operand.hbm [shape: f32[16,128], index: 0, kind: input, shape index: {}]   ;;  %s366_s1 = inlined_call_operand.hbm [shape: f32[128,128], index: 1, kind: input, shape index: {}]   ;;  %s367_s2 = inlined_call_operand.vmem [shape: f32[1,128], index: 2, kind: input, shape index: {}]   ;;  %s368_s3 = inlined_call_operand.hbm [shape: f32[16,128], index: 3, kind: output, shape index: {}]  }
   0x1   :  { %9 = vsyncpa [#allocation6], 0 }
   0x2   :  { %10 = vsyncpa [#allocation4], 0  ;;  %s319_s12 = smov [#allocation2]  }
   0x3   :  { %s16_s13 = sshll.u32 %s319_s12, 4  ;;  %s17_s13 = int_to_ptr.vmem [resolvable:$true] %s16_s13 }
   0x4   :  { %s261_s14 = scalar_lea.vmem %s17_s13, 256  ;;  %p266_p1 = scmp.lt.s32.totalorder %s17_s13, %s17_s13 }
   0x5   :  { %p262_p0 = scmp.ne.s32.totalorder %s17_s13, %s261_s14  ;;  %p267_p2 = scmp.lt.s32.totalorder %s261_s14, %s261_s14 }
   0x7   :  { %p268_p3 = por %p267_p2, %p266_p1 }
   0x9   :  { %p269_p4 = pnand %p268_p3, %p262_p0 }
   0xb   :  { %272 = shalt.err (!%p269_p4)
}
   0xc   :  { %s320_s15 = smov 128   ;;  %s321_s16 = smov 8  }
   0xd   :  { %22 = dma.hbm_to_vmem [thread:$0]  %s365_s0, 256, %s17_s13, [#allocation3], %s320_s15, %s320_s15, %s321_s16  }
   0xe   :  { %s322_s19 = smov [#allocation5]  }
   0xf   :  { %s28_s20 = sshll.u32 %s322_s19, 4  ;;  %s29_s20 = int_to_ptr.vmem [resolvable:$true] %s28_s20 }
  0x10   :  { %s281_s21 = scalar_lea.vmem %s29_s20, 2048  ;;  %p286_p6 = scmp.lt.s32.totalorder %s29_s20, %s29_s20 }
  0x11   :  { %p282_p5 = scmp.ne.s32.totalorder %s29_s20, %s281_s21  ;;  %p287_p7 = scmp.lt.s32.totalorder %s281_s21, %s281_s21 }
  0x13   :  { %p288_p8 = por %p287_p7, %p286_p6 }
  0x15   :  { %p289_p9 = pnand %p288_p8, %p282_p5 }
  0x17   :  { %292 = shalt.err (!%p289_p9)
}
  0x18   :  { %34 = dma.hbm_to_vmem [thread:$0]  %s366_s1, 2048, %s29_s20, [#allocation6], %s320_s15, %s320_s15, %s321_s16  }
  0x19   :  { %313 = dma.done.wait [#allocation3], 256  }
  0x1a   :  { %314 = vsyncadd [#allocation3], 4294967040 }
  0x1b   :  { %315 = dma.done.wait [#allocation6], 2048  }
  0x1c   :  { %316 = vsyncadd [#allocation6], 4294965248  ;;  %v43_v0 = vld [vmem:[#allocation2] sm:$0xff]  ;;  %v44_v1 = vld [vmem:[#allocation2 + $0x8] sm:$0xff]  ;;  %v53_v6 = vlaneseq  ;;  %s323_s24 = smov [#allocation7]  }
  0x1d   :  { %45 = vadd.xlane.f32.xlu0 %v43_v0  ;;  %v87_v2 = vld [vmem:[#allocation5 + $0x78] sm:$0xff]  ;;  %v86_v3 = vld [vmem:[#allocation5 + $0x70] sm:$0xff]  ;;  %v85_v4 = vld [vmem:[#allocation5 + $0x68] sm:$0xff]  ;;  %s177_s25 = sshll.u32 %s323_s24, 4  ;;  %s178_s25 = int_to_ptr.vmem [resolvable:$true] %s177_s25 }
  0x1e   :  { %209 = vmatprep.subr.mxu0 %v87_v2  ;;  %v84_v5 = vld [vmem:[#allocation5 + $0x60] sm:$0xff]  ;;  %v54_v7 = vand.u32 127, %v53_v6  ;;  %v83_v18 = vld [vmem:[#allocation5 + $0x58] sm:$0xff]  ;;  %v82_v19 = vld [vmem:[#allocation5 + $0x50] sm:$0xff]  ;;  %s293_s26 = scalar_lea.vmem %s178_s25, 256  ;;  %p298_p11 = scmp.lt.s32.totalorder %s178_s25, %s178_s25 }
  0x1f   :  { %210 = vmatpush3.msra.mxu0 %v87_v2  ;;  %v81_v20 = vld [vmem:[#allocation5 + $0x48] sm:$0xff]  ;;  %v80_v21 = vld [vmem:[#allocation5 + $0x40] sm:$0xff]  ;;  %v79_v22 = vld [vmem:[#allocation5 + $0x38] sm:$0xff]  ;;  %p294_p10 = scmp.ne.s32.totalorder %s178_s25, %s293_s26  ;;  %p299_p12 = scmp.lt.s32.totalorder %s293_s26, %s293_s26 }
  0x20   :  { %211 = vmatprep.subr.mxu0 %v86_v3  ;;  %vm55_vm0 = vcmp.lt.s32.totalorder %v54_v7, 32  ;;  %v78_v23 = vld [vmem:[#allocation5 + $0x30] sm:$0xff]  ;;  %v77_v24 = vld [vmem:[#allocation5 + $0x28] sm:$0xff]  ;;  %v76_v25 = vld [vmem:[#allocation5 + $0x20] sm:$0xff] }
  0x21   :  { %47 = vadd.xlane.f32.xlu0 %v44_v1  ;;  %212 = vmatpush3.msra.mxu0 %v86_v3  ;;  %v75_v26 = vld [vmem:[#allocation5 + $0x18] sm:$0xff]  ;;  %v74_v27 = vld [vmem:[#allocation5 + $0x10] sm:$0xff]  ;;  %v73_v28 = vld [vmem:[#allocation5 + $0x8] sm:$0xff]  ;;  %p300_p13 = por %p299_p12, %p298_p11 }
  0x22   :  { %213 = vmatprep.subr.mxu0 %v85_v4  ;;  %v72_v29 = vld [vmem:[#allocation5] sm:$0xff]  ;;  %v190_v40 = vld [vmem:[%s367_s2] ss:$0 sm:$0xff] }
  0x23   :  { %214 = vmatpush3.msra.mxu0 %v85_v4  ;;  %p301_p0 = pnand %p300_p13, %p294_p10 }
  0x24   :  { %215 = vmatprep.subr.mxu0 %v84_v5 }
  0x25   :  { %216 = vmatpush3.msra.mxu0 %v84_v5 }
  0x26   :  { %217 = vmatprep.subr.mxu0 %v83_v18 }
  0x27   :  { %218 = vmatpush3.msra.mxu0 %v83_v18 }
  0x28   :  { %219 = vmatprep.subr.mxu0 %v82_v19 }
  0x29   :  { %220 = vmatpush3.msra.mxu0 %v82_v19 }
  0x2a   :  { %221 = vmatprep.subr.mxu0 %v81_v20 }
  0x2b   :  { %222 = vmatpush3.msra.mxu0 %v81_v20 }
  0x2c   :  { %223 = vmatprep.subr.mxu0 %v80_v21 }
  0x2d   :  { %224 = vmatpush3.msra.mxu0 %v80_v21 }
  0x2e   :  { %225 = vmatprep.subr.mxu0 %v79_v22 }
  0x2f   :  { %226 = vmatpush3.msra.mxu0 %v79_v22 }
  0x30   :  { %227 = vmatprep.subr.mxu0 %v78_v23 }
  0x31   :  { %228 = vmatpush3.msra.mxu0 %v78_v23 }
  0x32   :  { %229 = vmatprep.subr.mxu0 %v77_v24 }
  0x33   :  { %230 = vmatpush3.msra.mxu0 %v77_v24 }
  0x34   :  { %231 = vmatprep.subr.mxu0 %v76_v25 }
  0x35   :  { %232 = vmatpush3.msra.mxu0 %v76_v25 }
  0x36   :  { %233 = vmatprep.subr.mxu0 %v75_v26 }
  0x37   :  { %234 = vmatpush3.msra.mxu0 %v75_v26 }
  0x38   :  { %235 = vmatprep.subr.mxu0 %v74_v27 }
  0x39   :  { %236 = vmatpush3.msra.mxu0 %v74_v27 }
  0x3a   :  { %237 = vmatprep.subr.mxu0 %v73_v28 }
  0x3b   :  { %238 = vmatpush3.msra.mxu0 %v73_v28 }
  0x3c   :  { %239 = vmatprep.subr.mxu0 %v72_v29 }
  0x3d   :  { %240 = vmatpush3.msra.mxu0 %v72_v29 }
  0xa6   :  { %v46_v8 = vpop.xlane.xlu0 %45 }
  0xa7   :  { %v49_v9 = vmul.f32 0.03125, %v46_v8 }
  0xa9   :  { %v51_v10 = vsub.f32 %v43_v0, %v49_v9 }
  0xaa   :  { %v48_v11 = vpop.xlane.xlu0 %47 }
  0xab   :  { %v50_v12 = vmul.f32 0.03125, %v48_v11  ;;  %v56_v13 = vsel %vm55_vm0, %v51_v10, 0.0 }
  0xac   :  { %v58_v14 = vmul.f32 %v56_v13, %v56_v13 }
  0xad   :  { %v52_v15 = vsub.f32 %v44_v1, %v50_v12 }
  0xae   :  { %60 = vadd.xlane.f32.xlu1 %v58_v14 }
  0xaf   :  { %v57_v16 = vsel %vm55_vm0, %v52_v15, 0.0 }
  0xb0   :  { %v59_v17 = vmul.f32 %v57_v16, %v57_v16 }
  0xb2   :  { %62 = vadd.xlane.f32.xlu1 %v59_v17 }
 0x137   :  { %v61_v30 = vpop.xlane.xlu1 %60 }
 0x138   :  { %v64_v31 = vmul.f32 0.03125, %v61_v30 }
 0x13a   :  { %v66_v32 = vadd.f32 1e-05, %v64_v31 }
 0x13b   :  { %v63_v33 = vpop.xlane.xlu1 %62 }
 0x13c   :  { %249 = vrsqrt.f32 %v66_v32  ;;  %v65_v34 = vmul.f32 0.03125, %v63_v33 }
 0x13e   :  { %v67_v35 = vadd.f32 1e-05, %v65_v34 }
 0x140   :  { %251 = vrsqrt.f32 %v67_v35 }
 0x149   :  { %v250_v36 = vpop.eup %249 }
 0x14a   :  { %v70_v37 = vmul.f32 %v250_v36, %v56_v13 }
 0x14c   :  { %241 = vmatprep.mubr.f32.mxu0 %v70_v37 }
 0x14d   :  { %v252_v38 = vpop.eup %251 }
 0x14e   :  { %v71_v39 = vmul.f32 %v252_v38, %v57_v16 }
 0x150   :  { %242 = vmatmul.mubr.f32.vlgmr.msra.gmra.mxu0 %v71_v39 }
 0x210   :  { %v243_v41 = vpop.f32.mrf.mxu0 }
 0x211   :  { %v167_v42 = vadd.f32 %v243_v41, %v190_v40 }
 0x212   :  { %v161_v43 = vpop.f32.mrf.mxu0 }
 0x213   :  { %171 = vst [vmem:[#allocation7 + $0x8] sm:$0xff] %v167_v42  ;;  %v162_v44 = vadd.f32 %v190_v40, %v161_v43 }
 0x215   :  { %170 = vst [vmem:[#allocation7] sm:$0xff] %v162_v44 }
 0x216   :  { %304 = shalt.err (!%p301_p0)
}
 0x217   :  { %183 = dma.vmem_to_hbm [thread:$0]  %s178_s25, 256, %s368_s3, [#allocation4], %s320_s15, %s320_s15, %s321_s16  }
 0x218   :  { %317 = dma.done.wait [#allocation4], 256  }
 0x219   :  { %318 = vsyncadd [#allocation4], 4294967040 }
 0x21a   :  { %187 = vsyncpa [#allocation3], 1 }
 0x21b   :  { %188 = vsyncpa [#allocation6], 1 }
 0x21c   :  { %189 = vsyncpa [#allocation4], 1 }

</bundles_post_ra>
